<compile_context>
chip_gen: v7x
topology: tpu7x:2x2x1
jax: 0.10.0
libtpu: 0.0.40
codegen_flags: <defaults>
</compile_context>

<pallas_src>
import numpy as np
import jax
import jax.numpy as jnp
from jax.experimental import pallas as pl
from jax.experimental.pallas import tpu as pltpu


def _cdiv(a, b):
    return -(-a // b)


def _vmem_capacity_bytes():
    # Device-aware VMEM capacity (64 MiB/TC on v7x, 128 MiB on v5e/v6e).
    try:
        return int(pltpu.get_tpu_info().vmem_capacity_bytes)
    except Exception:
        return 64 * 1024 * 1024  # conservative fallback (v7x per-core)


def _make_kernel_batch_blocks(k, pad, bn, H, W):
    """Layout A: (bn, H, W) blocks -- batch on the outer dim, W on lanes."""
    Hp, Wp = H + 2 * pad, W + 2 * pad

    def kernel(w_ref, x_ref, out_ref, xpad_ref):
        # Zero ONLY the halo strips (the interior is overwritten right below).
        # Re-zeroed every step so "parallel" scheduling stays correct even
        # though the scratch persists across steps/cores.
        if pad > 0:
            xpad_ref[:, 0:pad, :] = jnp.zeros((bn, pad, Wp), jnp.float32)
            xpad_ref[:, pad + H:Hp, :] = jnp.zeros((bn, pad, Wp), jnp.float32)
            xpad_ref[:, pad:pad + H, 0:pad] = jnp.zeros((bn, H, pad), jnp.float32)
            xpad_ref[:, pad:pad + H, pad + W:Wp] = jnp.zeros((bn, H, pad), jnp.float32)
        # Single upcast on copy-in (not once per tap).
        xpad_ref[:, pad:pad + H, pad:pad + W] = x_ref[...].astype(jnp.float32)

        # k*k shifted-window MACs on the VPU, f32 accumulation.
        acc = w_ref[0, 0] * xpad_ref[:, 0:H, 0:W]
        for dy in range(k):
            for dx in range(k):
                if dy == 0 and dx == 0:
                    continue
                acc = acc + w_ref[dy, dx] * xpad_ref[:, dy:dy + H, dx:dx + W]

        out_ref[...] = jnp.clip(acc, 0.0, 1.0).astype(out_ref.dtype)

    return kernel


def _make_kernel_batch_lanes(k, pad, H, W, bl):
    """Layout B: (H, W, bl) blocks -- batch on the 128-lane axis (lane-dense)."""
    Hp, Wp = H + 2 * pad, W + 2 * pad

    def kernel(w_ref, x_ref, out_ref, xpad_ref):
        if pad > 0:
            xpad_ref[0:pad, :, :] = jnp.zeros((pad, Wp, bl), jnp.float32)
            xpad_ref[pad + H:Hp, :, :] = jnp.zeros((pad, Wp, bl), jnp.float32)
            xpad_ref[pad:pad + H, 0:pad, :] = jnp.zeros((H, pad, bl), jnp.float32)
            xpad_ref[pad:pad + H, pad + W:Wp, :] = jnp.zeros((H, pad, bl), jnp.float32)
        xpad_ref[pad:pad + H, pad:pad + W, :] = x_ref[...].astype(jnp.float32)

        # All tap shifts are outer/sublane slices; lanes stay at offset 0 and
        # the output stores are unmasked full-lane stores.
        acc = w_ref[0, 0] * xpad_ref[0:H, 0:W, :]
        for dy in range(k):
            for dx in range(k):
                if dy == 0 and dx == 0:
                    continue
                acc = acc + w_ref[dy, dx] * xpad_ref[dy:dy + H, dx:dx + W, :]

        out_ref[...] = jnp.clip(acc, 0.0, 1.0).astype(out_ref.dtype)

    return kernel


def torch_filter_forward(x, filter_weight, *,
                         block_payload_bytes=2 * 1024 * 1024,
                         batch_on_lanes_min_n=128):
    """Pallas equivalent of torch_filter.forward.

    x:             (N, 1, H, W) float array (NCHW, single channel)
    filter_weight: (k, k) float array
    returns:       (N, 1, H, W) = clip(conv2d(x, w, padding=(k-1)//2), 0, 1)
    """
    N, C, H, W = x.shape
    assert C == 1, "torch_filter uses a 1-in/1-out channel conv"
    k = int(filter_weight.shape[0])
    assert k % 2 == 1, "padding=(k-1)//2 only gives 'same' output for odd k"
    pad = (k - 1) // 2
    Hp, Wp = H + 2 * pad, W + 2 * pad

    w = jnp.asarray(filter_weight, dtype=jnp.float32)
    x2 = x.reshape(N, H, W)
    esz = jnp.dtype(x.dtype).itemsize
    plane_bytes = H * W * esz

    vmem_cap = _vmem_capacity_bytes()
    # ~1-2 MiB of input payload per grid step already reaches ~roofline;
    # larger blocks only add spill/VMEM pressure and starve the pipeline.
    payload = max(256 * 1024, min(block_payload_bytes, vmem_cap // 16))

    def vmem_limit_for(block_bytes):
        limit = int(min(int(vmem_cap * 0.75),
                        max(32 * 1024 * 1024, 2 * block_bytes + 4 * 1024 * 1024)))
        if block_bytes > limit:
            # TODO(synk): row-tile very large planes with a (k-1)-row halo
            # instead of whole-plane blocks once a plane no longer fits VMEM.
            raise NotImplementedError("image plane too large for whole-plane blocks")
        return limit

    # --- Layout B: batch on the 128-lane axis (lane-dense for small W). -----
    use_lanes = (N >= batch_on_lanes_min_n) and (W < 128)
    if use_lanes:
        lanes_budget = max(1, payload // (128 * plane_bytes))
        bl = 128 * int(min(lanes_budget, max(1, _cdiv(N, 2 * 128))))
        block_bytes = 4 * bl * plane_bytes + bl * Hp * Wp * 4  # dbl-buf io + scratch
        if block_bytes > vmem_cap // 2:
            use_lanes = False

    if use_lanes:
        vmem_limit = vmem_limit_for(block_bytes)
        Nl = _cdiv(N, bl) * bl
        xt = jnp.transpose(x2, (1, 2, 0))            # (H, W, N): batch on lanes
        if Nl != N:
            xt = jnp.pad(xt, ((0, 0), (0, 0), (0, Nl - N)))
        out_t = pl.pallas_call(
            _make_kernel_batch_lanes(k, pad, H, W, bl),
            out_shape=jax.ShapeDtypeStruct((H, W, Nl), x.dtype),
            grid=(Nl // bl,),
            in_specs=[
                pl.BlockSpec(memory_space=pltpu.MemorySpace.SMEM),
                pl.BlockSpec((H, W, bl), lambda i: (0, 0, i)),
            ],
            out_specs=pl.BlockSpec((H, W, bl), lambda i: (0, 0, i)),
            scratch_shapes=[pltpu.VMEM((Hp, Wp, bl), jnp.float32)],
            compiler_params=pltpu.CompilerParams(
                dimension_semantics=("parallel",),
                vmem_limit_bytes=vmem_limit,
            ),
        )(w, xt)
        out = jnp.transpose(out_t, (2, 0, 1))[:N]
        return out.reshape(N, C, H, W)

    # --- Layout A: (bn, H, W) blocks (small N and/or already wide W). -------
    bn_budget = max(1, payload // plane_bytes)
    bn = int(min(N, bn_budget, max(1, _cdiv(N, 2))))  # >= 2 grid steps when N >= 2
    block_bytes = 4 * bn * plane_bytes + bn * Hp * Wp * 4
    vmem_limit = vmem_limit_for(block_bytes)

    out = pl.pallas_call(
        _make_kernel_batch_blocks(k, pad, bn, H, W),
        out_shape=jax.ShapeDtypeStruct((N, H, W), x.dtype),
        grid=(_cdiv(N, bn),),
        in_specs=[
            pl.BlockSpec(memory_space=pltpu.MemorySpace.SMEM),
            pl.BlockSpec((bn, H, W), lambda i: (i, 0, 0)),
        ],
        out_specs=pl.BlockSpec((bn, H, W), lambda i: (i, 0, 0)),
        scratch_shapes=[pltpu.VMEM((bn, Hp, Wp), jnp.float32)],
        compiler_params=pltpu.CompilerParams(
            dimension_semantics=("parallel",),
            vmem_limit_bytes=vmem_limit,
        ),
    )(w, x2)
    return out.reshape(N, C, H, W)


def _reference_forward(x, filter_weight):
    """Pure-JAX reference (matches nn.Conv2d cross-correlation + clip)."""
    k = filter_weight.shape[0]
    pad = (k - 1) // 2
    w = jnp.asarray(filter_weight, dtype=x.dtype)[None, None]  # OIHW
    y = jax.lax.conv_general_dilated(
        x, w, window_strides=(1, 1),
        padding=[(pad, pad), (pad, pad)],
        dimension_numbers=("NCHW", "OIHW", "NCHW"))
    return jnp.clip(y, 0.0, 1.0)


if __name__ == "__main__":
    k = 3
    # Deterministic synthetic filter weights (shape (k, k), like the numpy
    # filter_weight passed to torch_filter.__init__).
    filter_weight = (jnp.arange(k * k, dtype=jnp.float32).reshape(k, k) / (k * k)
                     - 0.25)

    # Primary small shape (exercises layout A: batch-blocked, 2-step grid).
    key = jax.random.PRNGKey(0)
    N, C, H, W = 2, 1, 16, 16
    x = jax.random.uniform(key, (N, C, H, W), dtype=jnp.float32)
    out = jax.block_until_ready(torch_filter_forward(x, filter_weight))
    ref = _reference_forward(x, filter_weight)
    np.testing.assert_allclose(np.asarray(out), np.asarray(ref),
                               rtol=1e-5, atol=1e-5)

    # Secondary check: exercises layout B (lane-dense batch-on-lanes, including
    # the zero-padded final lane block).
    x_big = jax.random.uniform(jax.random.PRNGKey(0), (130, 1, 16, 16),
                               dtype=jnp.float32)
    out_big = jax.block_until_ready(torch_filter_forward(x_big, filter_weight))
    ref_big = _reference_forward(x_big, filter_weight)
    np.testing.assert_allclose(np.asarray(out_big), np.asarray(ref_big),
                               rtol=1e-5, atol=1e-5)

    print("KERNEL_OK")
</pallas_src>

<mosaic_0001>
module attributes {stable_mosaic.version = 11 : i64} {
  func.func @kernel(%arg0: i32, %arg1: memref<3x3xf32, #tpu.memory_space<smem>>, %arg2: memref<1x16x16xf32, #tpu.memory_space<vmem>>, %arg3: memref<1x16x16xf32, #tpu.memory_space<vmem>>, %arg4: memref<1x18x18xf32, #tpu.memory_space<vmem>>) attributes {dimension_semantics = [#tpu.dimension_semantics<parallel>], iteration_bounds = array<i64: 2>, scalar_prefetch = 0 : i64, scratch_operands = 1 : i64, tpu.core_type = #tpu.core_type<tc>, window_params = [{transform_indices = @transform_0, window_bounds = array<i64: 3, 3>}, {transform_indices = @transform_1, window_bounds = array<i64: 1, 16, 16>}, {transform_indices = @transform_2, window_bounds = array<i64: 1, 16, 16>}]} {
    %cst = arith.constant 0.000000e+00 : f32
    %0 = vector.broadcast %cst : f32 to vector<1x1x18xf32>
    %c0 = arith.constant 0 : index
    %c0_0 = arith.constant 0 : index
    %c0_1 = arith.constant 0 : index
    %1 = vector.load %arg4[%c0, %c0_0, %c0_1] : memref<1x18x18xf32, #tpu.memory_space<vmem>>, vector<1x1x18xf32>
    tpu.vector_store %arg4[%c0, %c0_0, %c0_1], %0 {strides = array<i32>} : memref<1x18x18xf32, #tpu.memory_space<vmem>>, vector<1x1x18xf32>,
    %cst_2 = arith.constant 0.000000e+00 : f32
    %2 = vector.broadcast %cst_2 : f32 to vector<1x1x18xf32>
    %c0_3 = arith.constant 0 : index
    %c17 = arith.constant 17 : index
    %c0_4 = arith.constant 0 : index
    %3 = vector.load %arg4[%c0_3, %c17, %c0_4] : memref<1x18x18xf32, #tpu.memory_space<vmem>>, vector<1x1x18xf32>
    tpu.vector_store %arg4[%c0_3, %c17, %c0_4], %2 {strides = array<i32>} : memref<1x18x18xf32, #tpu.memory_space<vmem>>, vector<1x1x18xf32>,
    %cst_5 = arith.constant 0.000000e+00 : f32
    %4 = vector.broadcast %cst_5 : f32 to vector<1x16x1xf32>
    %c0_6 = arith.constant 0 : index
    %c1 = arith.constant 1 : index
    %c0_7 = arith.constant 0 : index
    %5 = vector.load %arg4[%c0_6, %c1, %c0_7] : memref<1x18x18xf32, #tpu.memory_space<vmem>>, vector<1x16x1xf32>
    tpu.vector_store %arg4[%c0_6, %c1, %c0_7], %4 {strides = array<i32>} : memref<1x18x18xf32, #tpu.memory_space<vmem>>, vector<1x16x1xf32>,
    %cst_8 = arith.constant 0.000000e+00 : f32
    %6 = vector.broadcast %cst_8 : f32 to vector<1x16x1xf32>
    %c0_9 = arith.constant 0 : index
    %c1_10 = arith.constant 1 : index
    %c17_11 = arith.constant 17 : index
    %7 = vector.load %arg4[%c0_9, %c1_10, %c17_11] : memref<1x18x18xf32, #tpu.memory_space<vmem>>, vector<1x16x1xf32>
    tpu.vector_store %arg4[%c0_9, %c1_10, %c17_11], %6 {strides = array<i32>} : memref<1x18x18xf32, #tpu.memory_space<vmem>>, vector<1x16x1xf32>,
    %c0_12 = arith.constant 0 : index
    %c0_13 = arith.constant 0 : index
    %c0_14 = arith.constant 0 : index
    %8 = vector.load %arg2[%c0_12, %c0_13, %c0_14] : memref<1x16x16xf32, #tpu.memory_space<vmem>>, vector<1x16x16xf32>
    %c0_15 = arith.constant 0 : index
    %c1_16 = arith.constant 1 : index
    %c1_17 = arith.constant 1 : index
    %9 = vector.load %arg4[%c0_15, %c1_16, %c1_17] : memref<1x18x18xf32, #tpu.memory_space<vmem>>, vector<1x16x16xf32>
    tpu.vector_store %arg4[%c0_15, %c1_16, %c1_17], %8 {strides = array<i32>} : memref<1x18x18xf32, #tpu.memory_space<vmem>>, vector<1x16x16xf32>,
    %c0_18 = arith.constant 0 : index
    %c0_19 = arith.constant 0 : index
    %10 = memref.load %arg1[%c0_18, %c0_19] : memref<3x3xf32, #tpu.memory_space<smem>>
    %c0_20 = arith.constant 0 : index
    %c0_21 = arith.constant 0 : index
    %c0_22 = arith.constant 0 : index
    %11 = vector.load %arg4[%c0_20, %c0_21, %c0_22] : memref<1x18x18xf32, #tpu.memory_space<vmem>>, vector<1x16x16xf32>
    %12 = vector.broadcast %10 : f32 to vector<1x16x16xf32>
    %13 = arith.mulf %12, %11 : vector<1x16x16xf32>
    %c0_23 = arith.constant 0 : index
    %c1_24 = arith.constant 1 : index
    %14 = memref.load %arg1[%c0_23, %c1_24] : memref<3x3xf32, #tpu.memory_space<smem>>
    %c0_25 = arith.constant 0 : index
    %c0_26 = arith.constant 0 : index
    %c1_27 = arith.constant 1 : index
    %15 = vector.load %arg4[%c0_25, %c0_26, %c1_27] : memref<1x18x18xf32, #tpu.memory_space<vmem>>, vector<1x16x16xf32>
    %16 = vector.broadcast %14 : f32 to vector<1x16x16xf32>
    %17 = arith.mulf %16, %15 : vector<1x16x16xf32>
    %18 = arith.addf %13, %17 : vector<1x16x16xf32>
    %c0_28 = arith.constant 0 : index
    %c2 = arith.constant 2 : index
    %19 = memref.load %arg1[%c0_28, %c2] : memref<3x3xf32, #tpu.memory_space<smem>>
    %c0_29 = arith.constant 0 : index
    %c0_30 = arith.constant 0 : index
    %c2_31 = arith.constant 2 : index
    %20 = vector.load %arg4[%c0_29, %c0_30, %c2_31] : memref<1x18x18xf32, #tpu.memory_space<vmem>>, vector<1x16x16xf32>
    %21 = vector.broadcast %19 : f32 to vector<1x16x16xf32>
    %22 = arith.mulf %21, %20 : vector<1x16x16xf32>
    %23 = arith.addf %18, %22 : vector<1x16x16xf32>
    %c1_32 = arith.constant 1 : index
    %c0_33 = arith.constant 0 : index
    %24 = memref.load %arg1[%c1_32, %c0_33] : memref<3x3xf32, #tpu.memory_space<smem>>
    %c0_34 = arith.constant 0 : index
    %c1_35 = arith.constant 1 : index
    %c0_36 = arith.constant 0 : index
    %25 = vector.load %arg4[%c0_34, %c1_35, %c0_36] : memref<1x18x18xf32, #tpu.memory_space<vmem>>, vector<1x16x16xf32>
    %26 = vector.broadcast %24 : f32 to vector<1x16x16xf32>
    %27 = arith.mulf %26, %25 : vector<1x16x16xf32>
    %28 = arith.addf %23, %27 : vector<1x16x16xf32>
    %c1_37 = arith.constant 1 : index
    %c1_38 = arith.constant 1 : index
    %29 = memref.load %arg1[%c1_37, %c1_38] : memref<3x3xf32, #tpu.memory_space<smem>>
    %c0_39 = arith.constant 0 : index
    %c1_40 = arith.constant 1 : index
    %c1_41 = arith.constant 1 : index
    %30 = vector.load %arg4[%c0_39, %c1_40, %c1_41] : memref<1x18x18xf32, #tpu.memory_space<vmem>>, vector<1x16x16xf32>
    %31 = vector.broadcast %29 : f32 to vector<1x16x16xf32>
    %32 = arith.mulf %31, %30 : vector<1x16x16xf32>
    %33 = arith.addf %28, %32 : vector<1x16x16xf32>
    %c1_42 = arith.constant 1 : index
    %c2_43 = arith.constant 2 : index
    %34 = memref.load %arg1[%c1_42, %c2_43] : memref<3x3xf32, #tpu.memory_space<smem>>
    %c0_44 = arith.constant 0 : index
    %c1_45 = arith.constant 1 : index
    %c2_46 = arith.constant 2 : index
    %35 = vector.load %arg4[%c0_44, %c1_45, %c2_46] : memref<1x18x18xf32, #tpu.memory_space<vmem>>, vector<1x16x16xf32>
    %36 = vector.broadcast %34 : f32 to vector<1x16x16xf32>
    %37 = arith.mulf %36, %35 : vector<1x16x16xf32>
    %38 = arith.addf %33, %37 : vector<1x16x16xf32>
    %c2_47 = arith.constant 2 : index
    %c0_48 = arith.constant 0 : index
    %39 = memref.load %arg1[%c2_47, %c0_48] : memref<3x3xf32, #tpu.memory_space<smem>>
    %c0_49 = arith.constant 0 : index
    %c2_50 = arith.constant 2 : index
    %c0_51 = arith.constant 0 : index
    %40 = vector.load %arg4[%c0_49, %c2_50, %c0_51] : memref<1x18x18xf32, #tpu.memory_space<vmem>>, vector<1x16x16xf32>
    %41 = vector.broadcast %39 : f32 to vector<1x16x16xf32>
    %42 = arith.mulf %41, %40 : vector<1x16x16xf32>
    %43 = arith.addf %38, %42 : vector<1x16x16xf32>
    %c2_52 = arith.constant 2 : index
    %c1_53 = arith.constant 1 : index
    %44 = memref.load %arg1[%c2_52, %c1_53] : memref<3x3xf32, #tpu.memory_space<smem>>
    %c0_54 = arith.constant 0 : index
    %c2_55 = arith.constant 2 : index
    %c1_56 = arith.constant 1 : index
    %45 = vector.load %arg4[%c0_54, %c2_55, %c1_56] : memref<1x18x18xf32, #tpu.memory_space<vmem>>, vector<1x16x16xf32>
    %46 = vector.broadcast %44 : f32 to vector<1x16x16xf32>
    %47 = arith.mulf %46, %45 : vector<1x16x16xf32>
    %48 = arith.addf %43, %47 : vector<1x16x16xf32>
    %c2_57 = arith.constant 2 : index
    %c2_58 = arith.constant 2 : index
    %49 = memref.load %arg1[%c2_57, %c2_58] : memref<3x3xf32, #tpu.memory_space<smem>>
    %c0_59 = arith.constant 0 : index
    %c2_60 = arith.constant 2 : index
    %c2_61 = arith.constant 2 : index
    %50 = vector.load %arg4[%c0_59, %c2_60, %c2_61] : memref<1x18x18xf32, #tpu.memory_space<vmem>>, vector<1x16x16xf32>
    %51 = vector.broadcast %49 : f32 to vector<1x16x16xf32>
    %52 = arith.mulf %51, %50 : vector<1x16x16xf32>
    %53 = arith.addf %48, %52 : vector<1x16x16xf32>
    %cst_62 = arith.constant 0.000000e+00 : f32
    %cst_63 = arith.constant 1.000000e+00 : f32
    %54 = vector.broadcast %cst_62 : f32 to vector<1x16x16xf32>
    %55 = arith.maximumf %54, %53 : vector<1x16x16xf32>
    %56 = vector.broadcast %cst_63 : f32 to vector<1x16x16xf32>
    %57 = arith.minimumf %56, %55 : vector<1x16x16xf32>
    %c0_64 = arith.constant 0 : index
    %c0_65 = arith.constant 0 : index
    %c0_66 = arith.constant 0 : index
    %58 = vector.load %arg3[%c0_64, %c0_65, %c0_66] : memref<1x16x16xf32, #tpu.memory_space<vmem>>, vector<1x16x16xf32>
    tpu.vector_store %arg3[%c0_64, %c0_65, %c0_66], %57 {strides = array<i32>} : memref<1x16x16xf32, #tpu.memory_space<vmem>>, vector<1x16x16xf32>,
    return
  }
  func.func @transform_0(%arg0: i32) -> (i32, i32) {
    %c0_i32 = arith.constant 0 : i32
    %c0_i32_0 = arith.constant 0 : i32
    %c0_i32_1 = arith.constant 0 : i32
    return %c0_i32, %c0_i32_0 : i32, i32
  }
  func.func @transform_1(%arg0: i32) -> (i32, i32, i32) {
    %c0_i32 = arith.constant 0 : i32
    %c0_i32_0 = arith.constant 0 : i32
    %c0_i32_1 = arith.constant 0 : i32
    return %arg0, %c0_i32, %c0_i32_0 : i32, i32, i32
  }
  func.func @transform_2(%arg0: i32) -> (i32, i32, i32) {
    %c0_i32 = arith.constant 0 : i32
    %c0_i32_0 = arith.constant 0 : i32
    %c0_i32_1 = arith.constant 0 : i32
    return %arg0, %c0_i32, %c0_i32_0 : i32, i32, i32
  }
}

</mosaic_0001>

<bundles_post_ra>
// kernel: tpu_custom_call.1
= control target key start
LH: loop header
LB: loop body
LE: loop exit
PB: predicated region body
PF: predicated region fallthrough
CT: control target
= control target key end

     0   :  { %7 = vsyncpa [#allocation6], 0  ;;  %s849_s0 = inlined_call_operand.hbm [shape: f32[3,3], index: 0, kind: input, shape index: {}]   ;;  %s850_s1 = inlined_call_operand.hbm [shape: f32[2,16,16], index: 1, kind: input, shape index: {}]   ;;  %s851_s2 = inlined_call_operand.hbm [shape: f32[2,16,16], index: 2, kind: output, shape index: {}]  }
   0x1   :  { %8 = vsyncpa [#allocation4], 0 }
   0x2   :  { %10 = vsyncpa [#allocation4 + $0x1], 0 }
   0x3   :  { %11 = vsyncpa [#allocation5], 0 }
   0x4   :  { %13 = vsyncpa [#allocation5 + $0x1], 0  ;;  %s640_s9 = smov 0   ;;  %s642_s10 = smov 0  }
   0x5   :  { %s644_s11 = smov 0   ;;  %s646_s12 = smov 0  }
   0x6 LB: > { %s661_s13 = sadd.s32 4294967295, %s612_s12   ;;  %s408_s14 = sadd.s32 4294967294, %s612_s12   ;;  %s612_s12 = sphi %s646_s12, %s871_s12   ;;  %s608_s11 = sphi %s644_s11, %s870_s11   ;;  %s604_s10 = sphi %s642_s10, %s869_s10   ;;  %s600_s9 = sphi %s640_s9, %s868_s9  }
   0x7   : > { %s665_s15 = sadd.s32 1, %s612_s12   ;;  %s47_s16 = sadd.s32 1, %s608_s11 }
   0x8   : > { %s44_s17 = ssub.s32 %s612_s12, %s665_s15  ;;  %p54_p0 = scmp.ne.s32.totalorder %s608_s11, %s604_s10 }
   0x9   : > { %p45_p1 = scmp.eq.s32.totalorder %s44_s17, 0  ;;  %p55_p2 = scmp.eq.s32.totalorder %s612_s12, 0 }
   0xa   : > { %p60_p3 = scmp.ne.s32.totalorder %s604_s10, %s600_s9  ;;  %p852_p4 = scmp.eq.s32.totalorder %s661_s13, 0 }
   0xb   : > { %s677_s18 = scalar_select %p45_p1, %s608_s11, %s47_s16  }
   0xc   : > { %p679_p5 = por %p55_p2, %p54_p0  ;;  %p685_p6 = por %p852_p4, %p60_p3 }
   0xd   : > { %p84_p7 = scmp.eq.s32.totalorder %s661_s13, 1  ;;  %p90_p8 = scmp.eq.s32.totalorder %s408_s14, 1 }
   0xe   : > { %s856_s20 = scalar_select %p685_p6, 1, 0 }
   0xf   : > { %p409_p9 = scmp.ge.s32.totalorder %s612_s12, 1  ;;  %p97_p10 = scmp.lt.s32.totalorder %s612_s12, 3 }
  0x10   : > { %p692_p11 = por %p84_p7, %p54_p0  ;;  %p696_p12 = por %p90_p8, %p60_p3 }
  0x11   : > { %p700_p13 = pnand %p409_p9, %p97_p10  ;;  %p455_p4 = scmp.lt.s32.totalorder %s612_s12, 2 }
  0x12   : > { %s857_s21 = scalar_select %p692_p11, 1, 0 }
  0x13   : > { %s858_s22 = scalar_select %p696_p12, 1, 0 }
  0x14   : > { %p442_p2 = pneg %p700_p13  ;;  %s119_s24 = sand.u32 1, %s608_s11  }
  0x15   : > { %s432_s25 = sshll.u32 %s612_s12, 8  ;;  %p860_p6 = scmp.eq.s32.totalorder %s661_s13, 0 }
  0x16   : > { %p714_p7 = pnand %p455_p4, %p679_p5  ;;  %s412_s27 = sshll.u32 %s119_s24, 4 }
  0x17   : > { %p443_p0 = pnand %p442_p2, %p860_p6  ;;  %s499_s30 = scalar_lea.hbm %s849_s0, 64 }
  0x18   : > { %p500_p3 = scmp.ne.s32.totalorder %s849_s0, %s499_s30  ;;  %p506_p6 = scmp.lt.u32.totalorder %s499_s30, %s849_s0 }
  0x19   : > { %p501_p8 = pneg %p443_p0 }
  0x1b   : > { %p502_p9 = pnand %p501_p8, %p500_p3 }
  0x1d   : > { %p503_p10 = pneg %p502_p9 }
  0x1f   : > { %p508_p4 = pnand %p506_p6, %p503_p10 }
  0x21   : > { %511 = shalt.err (!%p508_p4)
}
  0x22   : > { %s614_s7 = smov [#allocation3]   ;;  %s733_s19 = scalar_lea.hbm %s850_s1, %s432_s25 }
  0x23   : > { %445 = dma.hbm_to_smem (!%p443_p0), %s849_s0, 64, %s614_s7, [#allocation6]  }
  0x24   : > { %s123_s28 = scalar_lea.vmem [#allocation7], %s412_s27  ;;  %s737_s30 = scalar_lea.sflag [#allocation4], %s119_s24 }
  0x25   : > { %s130_s29 = sshll.u32 %s123_s28, 4  ;;  %s512_s3 = scalar_lea.hbm %s733_s19, 256  ;;  %s735_s29 = int_to_ptr.vmem [resolvable:$true] %s130_s29 }
  0x26   : > { %p513_p5 = scmp.ne.s32.totalorder %s733_s19, %s512_s3  ;;  %p514_p2 = pneg %p714_p7 }
  0x27   : > { %s517_s5 = scalar_lea.hbm %s850_s1, 512  ;;  %p518_p8 = scmp.lt.u32.totalorder %s733_s19, %s850_s1 }
  0x28   : > { %p515_p0 = pnand %p514_p2, %p513_p5  ;;  %p519_p9 = scmp.lt.u32.totalorder %s517_s5, %s512_s3 }
  0x29   : > { %p521_p6 = scmp.lt.u32.totalorder %s512_s3, %s733_s19 }
  0x2a   : > { %p516_p3 = pneg %p515_p0  ;;  %p520_p10 = por %p519_p9, %p518_p8 }
  0x2c   : > { %p522_p4 = por %p521_p6, %p520_p10 }
  0x2e   : > { %p523_p1 = pnand %p522_p4, %p516_p3 }
  0x30   : > { %526 = shalt.err (!%p523_p1)
}
  0x31   : > { %s527_s24 = scalar_lea.vmem %s735_s29, 256  ;;  %s615_s27 = smov [#allocation7]  }
  0x32   : > { %p528_p5 = scmp.ne.s32.totalorder %s735_s29, %s527_s24  ;;  %s532_s8 = sshll.u32 %s615_s27, 4  ;;  %s533_s8 = int_to_ptr.vmem [resolvable:$false] %s532_s8 }
  0x33   : > { %s534_s14 = scalar_lea.vmem %s533_s8, 512  ;;  %p535_p11 = scmp.lt.s32.totalorder %s735_s29, %s533_s8 }
  0x34   : > { %p530_p0 = pnand %p528_p5, %p514_p2  ;;  %p536_p8 = scmp.lt.s32.totalorder %s534_s14, %s527_s24 }
  0x36   : > { %p531_p12 = pneg %p530_p0  ;;  %p537_p9 = por %p536_p8, %p535_p11 }
  0x38   : > { %p538_p10 = pnand %p537_p9, %p531_p12 }
  0x3a   : > { %541 = shalt.err (!%p538_p10)
}
  0x3b   : > { %s616_s16 = smov 128   ;;  %s617_s17 = smov 8  }
  0x3c   : > { %449 = dma.hbm_to_vmem [thread:$0]  (!%p714_p7), %s733_s19, 256, %s735_s29, %s737_s30, %s616_s16, %s616_s16, %s617_s17  }
  0x3d   : > { %142 = sbr.rel (%p700_p13) target bundleno = 361 (0x169), region = 28  ;;  %p862_p1 = scmp.eq.s32.totalorder (!%p700_p13), %s661_s13, 0 }
  0x44   : > { %587 = dma.done.wait (%p862_p1), [#allocation6], 64   ;;  %p863_p2 = pmov %p862_p1 }
  0x45   : > { %s772_s28 = sand.u32 1, %s604_s10   ;;  %p864_p11 = scmp.ne.s32.totalorder %s856_s20, 0 }
  0x46   : > { %589 = vsyncadd (%p863_p2), [#allocation6], 4294967232  ;;  %s417_s3 = sshll.u32 %s772_s28, 4  ;;  %s149_s25 = scalar_lea.sflag [#allocation4], %s772_s28 }
  0x47   : > { %s152_s26 = scalar_lea.vmem [#allocation7], %s417_s3 }
  0x48   : > { %591 = dma.done.wait (%p864_p11), %s149_s25, 256  }
  0x49   : > { %593 = vsyncadd (%p864_p11), %s149_s25, 4294967040 }
  0x4a   : > { %157 = sfence }
  0x4b   : > { %v183_v0 = vld [vmem:[%s152_s26] sm:$0xff]  ;;  %vm174_vm0 = vcmask 139264   ;;  %s618_s23 = smov 1   ;;  %v619_v1 = vmov 0.0   ;;  %vm177_vm1 = vcmask 7168   ;;  %vm180_vm2 = vcmask 146568  }
  0x4c   : > { %187 = vrot.lane.b32.xlu0 %v183_v0, %s618_s23  ;;  %175 = vst.msk [vmem:[#allocation2] sm:$0x1] %vm174_vm0, %v619_v1  ;;  %176 = vst.msk [vmem:[#allocation2 + $0x11] sm:$0x1] %vm174_vm0, %v619_v1  ;;  %v184_v2 = vld [vmem:[%s152_s26 + $0x8] sm:$0xff]  ;;  %vm193_vm3 = vcmask 138248  }
  0x4d   : > { %178 = vst.msk [vmem:[#allocation2 + $0x1] sm:$0xff] %vm177_vm1, %v619_v1  ;;  %179 = vst.msk [vmem:[#allocation2 + $0x9] sm:$0xff] %vm177_vm1, %v619_v1  ;;  %s420_s19 = sld [smem:[#allocation3 + $0x2]]  ;;  %s419_s20 = sld [smem:[#allocation3 + $0x1]]  ;;  %vm306_vm4 = vcmask 130048  }
  0x4e   : > { %181 = vst.msk [vmem:[#allocation2 + $0x1] sm:$0xff] %vm180_vm2, %v619_v1  ;;  %182 = vst.msk [vmem:[#allocation2 + $0x9] sm:$0xff] %vm180_vm2, %v619_v1  ;;  %s782_s29 = sld [smem:[#allocation3 + $0x81]]  ;;  %s784_s30 = sld [smem:[#allocation3 + $0x82]] }
  0x4f   : > { %s425_s4 = sld [smem:[#allocation3 + $0x101]]  ;;  %s620_s5 = smov 126  }
  0x50   : > { %189 = vrot.lane.b32.xlu0 %v184_v2, %s618_s23  ;;  %s621_s6 = smov 127   ;;  %s426_s7 = sld [smem:[#allocation3 + $0x102]] }
  0x51   : > { %s196_s24 = sld [smem:[#allocation3]]  ;;  %s173_s14 = scalar_lea.vmem [#allocation8], %s417_s3 }
  0x52   : > { %s421_s27 = sld [smem:[#allocation3 + $0x80]]  ;;  %s323_s16 = sshll.u32 %s173_s14, 4  ;;  %s800_s16 = int_to_ptr.vmem [resolvable:$true] %s323_s16 }
  0x53   : > { %v217_v5 = vstv %s420_s19  ;;  %v203_v6 = vstv %s419_s20  ;;  %s794_s8 = sld [smem:[#allocation3 + $0x100]]  ;;  %s433_s17 = sshll.u32 %s661_s13, 8 }
  0x54   : > { %v239_v11 = vstv %s782_s29  ;;  %v253_v15 = vstv %s784_s30  ;;  %s805_s23 = scalar_lea.hbm %s851_s2, %s433_s17  ;;  %s310_s3 = scalar_lea.sflag [#allocation5], %s772_s28 }
  0x55   : > { %v275_v19 = vstv %s425_s4  ;;  %s542_s19 = scalar_lea.vmem %s800_s16, 256  ;;  %p865_p13 = scmp.ne.s32.totalorder %s857_s21, 0 }
  0x56   : > { %v289_v23 = vstv %s426_s7  ;;  %p543_p12 = scmp.ne.s32.totalorder %s800_s16, %s542_s19  ;;  %s622_s13 = smov [#allocation8]  }
  0x57   : > { %v199_v29 = vstv %s196_s24  ;;  %s546_s20 = sshll.u32 %s622_s13, 4  ;;  %s547_s20 = int_to_ptr.vmem [resolvable:$false] %s546_s20 }
  0x58   : > { %v233_v33 = vstv %s421_s27  ;;  %p544_p7 = pnand %p543_p12, %p865_p13  ;;  %s548_s29 = scalar_lea.vmem %s547_s20, 512 }
  0x59   : > { %v269_v41 = vstv %s794_s8  ;;  %p549_p6 = scmp.lt.s32.totalorder %s800_s16, %s547_s20  ;;  %p550_p4 = scmp.lt.s32.totalorder %s548_s29, %s542_s19 }
  0x5a   : > { %p545_p3 = pneg %p544_p7 }
  0x5b   : > { %p551_p5 = por %p550_p4, %p549_p6 }
  0x5d   : > { %p552_p0 = pnand %p551_p5, %p545_p3 }
  0xbe   : > { %v188_v3 = vpop.permute.xlu0 %187 }
  0xbf   : > { %194 = vst.msk [vmem:[#allocation2 + $0x1] sm:$0xff] %vm193_vm3, %v188_v3 }
  0xc2   : > { %v190_v4 = vpop.permute.xlu0 %189 }
  0xc3   : > { %195 = vst.msk [vmem:[#allocation2 + $0x9] sm:$0xff] %vm193_vm3, %v190_v4 }
  0xc6   : > { %v197_v7 = vld [vmem:[#allocation2] sm:$0xff] }
  0xc7   : > { %v218_v8 = vmul.f32 %v217_v5, %v197_v7  ;;  %v204_v9 = vmul.f32 %v203_v6, %v197_v7  ;;  %v231_v10 = vld [vmem:[#allocation2 + $0x1] sm:$0xff]  ;;  %v200_v30 = vmul.f32 %v199_v29, %v197_v7 }
  0xc8   : > { %v240_v14 = vmul.f32 %v239_v11, %v231_v10  ;;  %v254_v16 = vmul.f32 %v253_v15, %v231_v10  ;;  %v234_v36 = vmul.f32 %v233_v33, %v231_v10 }
  0xc9   : > { %222 = vrot.lane.b32.xlu0 %v218_v8, %s620_s5  ;;  %208 = vrot.lane.b32.xlu1 %v204_v9, %s621_s6 }
  0xca   : > { %v198_v12 = vld [vmem:[#allocation2 + $0x8] sm:$0xff] }
  0xcb   : > { %v205_v13 = vmul.f32 %v203_v6, %v198_v12  ;;  %v219_v17 = vmul.f32 %v217_v5, %v198_v12  ;;  %v267_v18 = vld [vmem:[#allocation2 + $0x2] sm:$0xff]  ;;  %v268_v26 = vld [vmem:[#allocation2 + $0xa] sm:$0xff]  ;;  %v201_v40 = vmul.f32 %v199_v29, %v198_v12 }
  0xcc   : > { %v232_v20 = vld [vmem:[#allocation2 + $0x9] sm:$0xff]  ;;  %v276_v21 = vmul.f32 %v275_v19, %v267_v18  ;;  %v290_v24 = vmul.f32 %v289_v23, %v267_v18  ;;  %v277_v27 = vmul.f32 %v275_v19, %v268_v26  ;;  %v291_v28 = vmul.f32 %v289_v23, %v268_v26 }
  0xcd   : > { %244 = vrot.lane.b32.xlu0 %v240_v14, %s621_s6  ;;  %210 = vrot.lane.b32.xlu1 %v205_v13, %s621_s6  ;;  %v241_v22 = vmul.f32 %v239_v11, %v232_v20  ;;  %v255_v25 = vmul.f32 %v253_v15, %v232_v20  ;;  %v270_v48 = vmul.f32 %v269_v41, %v267_v18 }
  0xce   : > { %v235_v49 = vmul.f32 %v233_v33, %v232_v20  ;;  %v271_v60 = vmul.f32 %v269_v41, %v268_v26 }
  0xd1   : > { %258 = vrot.lane.b32.xlu0 %v254_v16, %s620_s5  ;;  %224 = vrot.lane.b32.xlu1 %v219_v17, %s620_s5 }
  0xd5   : > { %280 = vrot.lane.b32.xlu0 %v276_v21, %s621_s6  ;;  %246 = vrot.lane.b32.xlu1 %v241_v22, %s621_s6 }
  0xd9   : > { %294 = vrot.lane.b32.xlu0 %v290_v24, %s620_s5  ;;  %260 = vrot.lane.b32.xlu1 %v255_v25, %s620_s5 }
  0xdd   : > { %282 = vrot.lane.b32.xlu1 %v277_v27, %s621_s6 }
  0xe1   : > { %296 = vrot.lane.b32.xlu1 %v291_v28, %s620_s5 }
 0x13b   : > { %v223_v31 = vpop.permute.xlu0 %222  ;;  %v209_v32 = vpop.permute.xlu1 %208 }
 0x13c   : > { %v214_v34 = vadd.f32 %v209_v32, %v200_v30 }
 0x13e   : > { %v228_v35 = vadd.f32 %v223_v31, %v214_v34 }
 0x13f   : > { %v245_v37 = vpop.permute.xlu0 %244  ;;  %v211_v38 = vpop.permute.xlu1 %210 }
 0x140   : > { %v236_v39 = vadd.f32 %v234_v36, %v228_v35  ;;  %v215_v43 = vadd.f32 %v211_v38, %v201_v40 }
 0x142   : > { %v250_v42 = vadd.f32 %v245_v37, %v236_v39 }
 0x143   : > { %v259_v44 = vpop.permute.xlu0 %258  ;;  %v225_v45 = vpop.permute.xlu1 %224 }
 0x144   : > { %v264_v46 = vadd.f32 %v259_v44, %v250_v42  ;;  %v229_v47 = vadd.f32 %v225_v45, %v215_v43 }
 0x146   : > { %v272_v50 = vadd.f32 %v270_v48, %v264_v46  ;;  %v237_v51 = vadd.f32 %v235_v49, %v229_v47 }
 0x147   : > { %v281_v52 = vpop.permute.xlu0 %280  ;;  %v247_v53 = vpop.permute.xlu1 %246 }
 0x148   : > { %v286_v54 = vadd.f32 %v281_v52, %v272_v50  ;;  %v251_v55 = vadd.f32 %v247_v53, %v237_v51 }
 0x14b   : > { %v295_v56 = vpop.permute.xlu0 %294  ;;  %v261_v57 = vpop.permute.xlu1 %260 }
 0x14c   : > { %v300_v58 = vadd.f32 %v295_v56, %v286_v54  ;;  %v265_v59 = vadd.f32 %v261_v57, %v251_v55 }
 0x14e   : > { %v302_v61 = vmax.f32 %v300_v58, 0.0  ;;  %v273_v62 = vadd.f32 %v271_v60, %v265_v59 }
 0x14f   : > { %v283_v63 = vpop.permute.xlu1 %282 }
 0x150   : > { %v304_v0 = vmin.f32 %v302_v61, 1.0  ;;  %v287_v1 = vadd.f32 %v283_v63, %v273_v62 }
 0x152   : > { %307 = vst.msk [vmem:[%s173_s14] sm:$0xff] %vm306_vm4, %v304_v0 }
 0x153   : > { %v297_v2 = vpop.permute.xlu1 %296 }
 0x154   : > { %v301_v3 = vadd.f32 %v297_v2, %v287_v1 }
 0x156   : > { %v303_v4 = vmax.f32 %v301_v3, 0.0 }
 0x158   : > { %v305_v5 = vmin.f32 %v303_v4, 1.0 }
 0x15a   : > { %308 = vst.msk [vmem:[%s173_s14 + $0x8] sm:$0xff] %vm306_vm4, %v305_v5 }
 0x15b   : > { %555 = shalt.err (!%p552_p0)
}
 0x15c   : > { %s556_s30 = scalar_lea.hbm %s805_s23, 256  ;;  %s560_s6 = scalar_lea.hbm %s851_s2, 512 }
 0x15d   : > { %p557_p8 = scmp.ne.s32.totalorder %s805_s23, %s556_s30  ;;  %p561_p1 = scmp.lt.u32.totalorder %s805_s23, %s851_s2 }
 0x15e   : > { %p562_p2 = scmp.lt.u32.totalorder %s560_s6, %s556_s30  ;;  %p564_p12 = scmp.lt.u32.totalorder %s556_s30, %s805_s23 }
 0x15f   : > { %p558_p9 = pnand %p557_p8, %p865_p13 }
 0x160   : > { %p563_p11 = por %p562_p2, %p561_p1 }
 0x161   : > { %p559_p10 = pneg %p558_p9 }
 0x162   : > { %p565_p7 = por %p564_p12, %p563_p11 }
 0x164   : > { %p566_p3 = pnand %p565_p7, %p559_p10 }
 0x166   : > { %569 = shalt.err (!%p566_p3)
}
 0x167   : > { %s623_s27 = smov 128   ;;  %s624_s8 = smov 8  }
 0x168   : > { %440 = dma.vmem_to_hbm [thread:$0]  (%p865_p13), %s800_s16, 256, %s805_s23, %s310_s3, %s623_s27, %s623_s27, %s624_s8  }
 0x169 PF: > { %s338_s14 = sand.u32 1, %s600_s9   ;;  %p866_p6 = scmp.ne.s32.totalorder %s858_s22, 0 }
 0x16a   : > { %p867_p4 = scmp.ge.s32.totalorder %s612_s12, 2  ;;  %s339_s17 = scalar_lea.sflag [#allocation5], %s338_s14 }
 0x16c   : > { %p451_p5 = pnand %p867_p4, %p866_p6 }
 0x16e   : > { %595 = dma.done.wait (!%p451_p5), %s339_s17, 256  }
 0x16f   : > { %597 = vsyncadd (!%p451_p5), %s339_s17, 4294967040  ;;  %p16_p0 = scmp.ge.s32.totalorder %s665_s15, 4   ;;  %s868_s9 = smov %s604_s10 }
 0x170   : > { %s869_s10 = smov %s608_s11  ;;  %s870_s11 = smov %s677_s18 }
 0x171   : > { %s871_s12 = smov %s665_s15  ;;  %18 = sbr.rel (!%p16_p0) target bundleno = 6 (0x6), region = 78 }
 0x178   :  { %344 = vsyncpa [#allocation4], 1 }
 0x179   :  { %346 = vsyncpa [#allocation4 + $0x1], 1 }
 0x17a   :  { %347 = vsyncpa [#allocation5], 1 }
 0x17b   :  { %349 = vsyncpa [#allocation5 + $0x1], 1 }
 0x17c   :  { %350 = vsyncpa [#allocation6], 1 }
 0x17d   :  { %352 = vsyncpa [#allocation6 + $0x1], 1 }

</bundles_post_ra>
